<compile_context>
chip_gen: v5e
topology: v5e:2x2
jax: 0.10.0
libtpu: 0.0.40
codegen_flags: <defaults>
</compile_context>

<pallas_src>
import functools

import jax
import jax.numpy as jnp
from jax.experimental import pallas as pl
from jax.experimental.pallas import tpu as pltpu


def _round_up(n: int, m: int) -> int:
    return ((n + m - 1) // m) * m


def _mlp_kernel(x_ref, wg_ref, wu_ref, wd_ref, imask_ref, omask_ref, o_ref, acc_ref):
    """Grid = (M tiles, I tiles).  One (tm, ti) slab of the gated MLP per step."""
    k = pl.program_id(1)

    @pl.when(k == 0)
    def _():
        acc_ref[...] = jnp.zeros_like(acc_ref)

    x = x_ref[...]  # keep native dtype (bf16 stays bf16) -> full-rate MXU

    # up_proj slice, masked.  f32 accumulation on the MXU.
    up = jnp.dot(x, wu_ref[...], preferred_element_type=jnp.float32)
    up = up * imask_ref[...]                      # broadcast [1, ti] over rows (VPU)

    # silu(gate_proj slice)  -- sigmoid goes to the EUP, mul to the VPU (free filler)
    gate = jnp.dot(x, wg_ref[...], preferred_element_type=jnp.float32)
    gate = gate * jax.nn.sigmoid(gate)

    # down_proj partial sum for this I slice.
    h = (gate * up).astype(x.dtype)
    acc_ref[...] += jnp.dot(h, wd_ref[...], preferred_element_type=jnp.float32)

    @pl.when(k == pl.num_programs(1) - 1)
    def _():
        o_ref[...] = (acc_ref[...] * omask_ref[...]).astype(o_ref.dtype)


def softmask_llama_mlp(x, wg_t, wu_t, wd_t, input_mask=None, output_mask=None,
                       *, tm=256, ti=512):
    """Gated-SiLU MLP with optional soft masks.

    x:    [B, S, H]
    wg_t: [H, I]  (gate_proj weight, pre-transposed to [in, out])
    wu_t: [H, I]  (up_proj weight,   pre-transposed)
    wd_t: [I, H]  (down_proj weight, pre-transposed)
    input_mask:  broadcastable over I (e.g. [1, 1, I]) or None
    output_mask: broadcastable over H (e.g. [1, 1, H]) or None

    Defaults tm=256 / ti=512 target v6e/v7x; on v5e tm=128, ti=256 is a better fit.
    """
    B, S, H = x.shape
    Hw, I = wg_t.shape
    assert Hw == H and wu_t.shape == (H, I) and wd_t.shape == (I, H)
    M = B * S

    # ---- tile / padding choices (lane-dense last dims, no divisibility asserts) ----
    tm = min(tm, _round_up(M, 8))
    ti = min(ti, _round_up(I, 128))
    M_pad = _round_up(M, tm)
    H_pad = _round_up(H, 128)
    I_pad = _round_up(I, ti)

    act_sz = jnp.dtype(x.dtype).itemsize
    w_sz = jnp.dtype(wg_t.dtype).itemsize

    x2d = jnp.pad(x.reshape(M, H), ((0, M_pad - M), (0, H_pad - H)))
    wg_p = jnp.pad(wg_t, ((0, H_pad - H), (0, I_pad - I)))
    wu_p = jnp.pad(wu_t, ((0, H_pad - H), (0, I_pad - I)))
    wd_p = jnp.pad(wd_t, ((0, I_pad - I), (0, H_pad - H)))

    if input_mask is None:
        imask = jnp.ones((1, I_pad), dtype=jnp.float32)
    else:
        imask = jnp.asarray(input_mask, dtype=jnp.float32).reshape(1, I)
        imask = jnp.pad(imask, ((0, 0), (0, I_pad - I)))
    if output_mask is None:
        omask = jnp.ones((1, H_pad), dtype=jnp.float32)
    else:
        omask = jnp.asarray(output_mask, dtype=jnp.float32).reshape(1, H)
        omask = jnp.pad(omask, ((0, 0), (0, H_pad - H)))

    # ---- VMEM budget: double-buffered inputs/outputs + f32 accumulator ----
    vmem_bytes = int(
        2 * tm * H_pad * act_sz          # x tile
        + 2 * tm * H_pad * act_sz        # output tile
        + 2 * 2 * H_pad * ti * w_sz      # gate + up weight slices
        + 2 * ti * H_pad * w_sz          # down weight slice
        + tm * H_pad * 4                 # f32 accumulator
        + 2 * (ti + H_pad) * 4           # masks
    )
    vmem_limit = min(max(int(vmem_bytes * 1.5) + (2 << 20), 8 << 20), 64 << 20)

    grid = (M_pad // tm, I_pad // ti)

    out2d = pl.pallas_call(
        _mlp_kernel,
        out_shape=jax.ShapeDtypeStruct((M_pad, H_pad), x.dtype),
        grid_spec=pltpu.PrefetchScalarGridSpec(
            num_scalar_prefetch=0,
            grid=grid,
            in_specs=[
                pl.BlockSpec((tm, H_pad), lambda i, k: (i, 0)),   # x tile
                pl.BlockSpec((H_pad, ti), lambda i, k: (0, k)),   # gate weight slice
                pl.BlockSpec((H_pad, ti), lambda i, k: (0, k)),   # up weight slice
                pl.BlockSpec((ti, H_pad), lambda i, k: (k, 0)),   # down weight slice
                pl.BlockSpec((1, ti),     lambda i, k: (0, k)),   # input mask slice
                pl.BlockSpec((1, H_pad),  lambda i, k: (0, 0)),   # output mask
            ],
            out_specs=pl.BlockSpec((tm, H_pad), lambda i, k: (i, 0)),
            scratch_shapes=[pltpu.VMEM((tm, H_pad), jnp.float32)],
        ),
        compiler_params=pltpu.CompilerParams(
            dimension_semantics=("parallel", "arbitrary"),
            vmem_limit_bytes=vmem_limit),
    )(x2d, wg_p, wu_p, wd_p, imask, omask)

    return out2d[:M, :H].reshape(B, S, H)


def _reference(x, w_gate, w_up, w_down, input_mask, output_mask):
    """Plain-JAX reference mirroring the PyTorch forward (eval mode)."""
    up = x @ w_up.T
    if input_mask is not None:
        up = up * input_mask
    gate = x @ w_gate.T
    gate = gate * jax.nn.sigmoid(gate)
    h = gate * up
    out = h @ w_down.T
    if output_mask is not None:
        out = out * output_mask
    return out


if __name__ == "__main__":
    # Small shapes consistent with the module: batch=2, seq=8, hidden=32, intermediate=64
    B, S, H, I = 2, 8, 32, 64

    key = jax.random.PRNGKey(0)
    kx, kg, ku, kd, kim, kom = jax.random.split(key, 6)

    x = jax.random.normal(kx, (B, S, H), dtype=jnp.float32)
    # PyTorch "Linear" convention: weight is [out_features, in_features]
    w_gate = jax.random.normal(kg, (I, H), dtype=jnp.float32) * (1.0 / jnp.sqrt(H))
    w_up   = jax.random.normal(ku, (I, H), dtype=jnp.float32) * (1.0 / jnp.sqrt(H))
    w_down = jax.random.normal(kd, (H, I), dtype=jnp.float32) * (1.0 / jnp.sqrt(I))
    # Soft masks broadcast over tokens (as in SoftMask pruning)
    input_mask  = jax.random.uniform(kim, (1, 1, I), dtype=jnp.float32)
    output_mask = jax.random.uniform(kom, (1, 1, H), dtype=jnp.float32)

    # One-time pre-transpose to [in, out] OUTSIDE the hot path (no per-call W.T).
    wg_t, wu_t, wd_t = w_gate.T, w_up.T, w_down.T

    out = softmask_llama_mlp(x, wg_t, wu_t, wd_t, input_mask, output_mask)
    out = jax.block_until_ready(out)

    ref = _reference(x, w_gate, w_up, w_down, input_mask, output_mask)
    assert out.shape == (B, S, H)
    assert jnp.allclose(out, ref, atol=1e-4, rtol=1e-4), "mismatch vs reference"

    print("KERNEL_OK")
</pallas_src>

<mosaic_0001>
module attributes {stable_mosaic.version = 11 : i64} {
  func.func @_mlp_kernel(%arg0: i32, %arg1: i32, %arg2: memref<16x128xf32, #tpu.memory_space<vmem>>, %arg3: memref<128x128xf32, #tpu.memory_space<vmem>>, %arg4: memref<128x128xf32, #tpu.memory_space<vmem>>, %arg5: memref<128x128xf32, #tpu.memory_space<vmem>>, %arg6: memref<1x128xf32, #tpu.memory_space<vmem>>, %arg7: memref<1x128xf32, #tpu.memory_space<vmem>>, %arg8: memref<16x128xf32, #tpu.memory_space<vmem>>, %arg9: memref<16x128xf32, #tpu.memory_space<vmem>>) attributes {dimension_semantics = [#tpu.dimension_semantics<parallel>, #tpu.dimension_semantics<arbitrary>], iteration_bounds = array<i64: 1, 1>, scalar_prefetch = 0 : i64, scratch_operands = 1 : i64, tpu.core_type = #tpu.core_type<tc>, window_params = [{transform_indices = @transform_0, window_bounds = array<i64: 16, 128>}, {transform_indices = @transform_1, window_bounds = array<i64: 128, 128>}, {transform_indices = @transform_2, window_bounds = array<i64: 128, 128>}, {transform_indices = @transform_3, window_bounds = array<i64: 128, 128>}, {transform_indices = @transform_4, window_bounds = array<i64: 1, 128>}, {pipeline_mode = #tpu.pipeline_mode<synchronous>, transform_indices = @transform_5, window_bounds = array<i64: 1, 128>}, {transform_indices = @transform_6, window_bounds = array<i64: 16, 128>}]} {
    %c0_i32 = arith.constant 0 : i32
    %0 = arith.cmpi eq, %arg1, %c0_i32 : i32
    %1 = arith.extui %0 : i1 to i32
    %c0_i32_0 = arith.constant 0 : i32
    %2 = arith.cmpi ne, %1, %c0_i32_0 : i32
    scf.if %2 {
      %cst_19 = arith.constant 0.000000e+00 : f32
      %26 = vector.broadcast %cst_19 : f32 to vector<16x128xf32>
      %c0_20 = arith.constant 0 : index
      %c0_21 = arith.constant 0 : index
      %27 = vector.load %arg9[%c0_20, %c0_21] : memref<16x128xf32, #tpu.memory_space<vmem>>, vector<16x128xf32>
      tpu.vector_store %arg9[%c0_20, %c0_21], %26 {strides = array<i32>} : memref<16x128xf32, #tpu.memory_space<vmem>>, vector<16x128xf32>,
    } else {
    }
    %c0 = arith.constant 0 : index
    %c0_1 = arith.constant 0 : index
    %3 = vector.load %arg2[%c0, %c0_1] : memref<16x128xf32, #tpu.memory_space<vmem>>, vector<16x128xf32>
    %c0_2 = arith.constant 0 : index
    %c0_3 = arith.constant 0 : index
    %4 = vector.load %arg4[%c0_2, %c0_3] : memref<128x128xf32, #tpu.memory_space<vmem>>, vector<128x128xf32>
    %cst = arith.constant dense<0.000000e+00> : vector<16x128xf32>
    %5 = tpu.matmul %3, %4, %cst {dimension_numbers = #tpu.dot_dimension_numbers<[1], [0], [0], [1], [0, 0, 1, 1], [], []>} : vector<16x128xf32>, vector<128x128xf32>, vector<16x128xf32> -> vector<16x128xf32>
    %c0_4 = arith.constant 0 : index
    %c0_5 = arith.constant 0 : index
    %6 = vector.load %arg6[%c0_4, %c0_5] : memref<1x128xf32, #tpu.memory_space<vmem>>, vector<1x128xf32>
    %7 = vector.broadcast %6 : vector<1x128xf32> to vector<16x128xf32>
    %8 = arith.mulf %5, %7 : vector<16x128xf32>
    %c0_6 = arith.constant 0 : index
    %c0_7 = arith.constant 0 : index
    %9 = vector.load %arg3[%c0_6, %c0_7] : memref<128x128xf32, #tpu.memory_space<vmem>>, vector<128x128xf32>
    %cst_8 = arith.constant dense<0.000000e+00> : vector<16x128xf32>
    %10 = tpu.matmul %3, %9, %cst_8 {dimension_numbers = #tpu.dot_dimension_numbers<[1], [0], [0], [1], [0, 0, 1, 1], [], []>} : vector<16x128xf32>, vector<128x128xf32>, vector<16x128xf32> -> vector<16x128xf32>
    %11 = arith.negf %10 : vector<16x128xf32>
    %12 = math.exp %11 : vector<16x128xf32>
    %cst_9 = arith.constant 1.000000e+00 : f32
    %13 = vector.broadcast %cst_9 : f32 to vector<16x128xf32>
    %14 = arith.addf %13, %12 : vector<16x128xf32>
    %15 = arith.divf %13, %14 : vector<16x128xf32>
    %16 = arith.mulf %10, %15 : vector<16x128xf32>
    %17 = arith.mulf %16, %8 : vector<16x128xf32>
    %c0_10 = arith.constant 0 : index
    %c0_11 = arith.constant 0 : index
    %18 = vector.load %arg9[%c0_10, %c0_11] : memref<16x128xf32, #tpu.memory_space<vmem>>, vector<16x128xf32>
    %c0_12 = arith.constant 0 : index
    %c0_13 = arith.constant 0 : index
    %19 = vector.load %arg5[%c0_12, %c0_13] : memref<128x128xf32, #tpu.memory_space<vmem>>, vector<128x128xf32>
    %cst_14 = arith.constant dense<0.000000e+00> : vector<16x128xf32>
    %20 = tpu.matmul %17, %19, %cst_14 {dimension_numbers = #tpu.dot_dimension_numbers<[1], [0], [0], [1], [0, 0, 1, 1], [], []>} : vector<16x128xf32>, vector<128x128xf32>, vector<16x128xf32> -> vector<16x128xf32>
    %21 = arith.addf %18, %20 : vector<16x128xf32>
    %c0_15 = arith.constant 0 : index
    %c0_16 = arith.constant 0 : index
    %22 = vector.load %arg9[%c0_15, %c0_16] : memref<16x128xf32, #tpu.memory_space<vmem>>, vector<16x128xf32>
    tpu.vector_store %arg9[%c0_15, %c0_16], %21 {strides = array<i32>} : memref<16x128xf32, #tpu.memory_space<vmem>>, vector<16x128xf32>,
    %c0_i32_17 = arith.constant 0 : i32
    %23 = arith.cmpi eq, %arg1, %c0_i32_17 : i32
    %24 = arith.extui %23 : i1 to i32
    %c0_i32_18 = arith.constant 0 : i32
    %25 = arith.cmpi ne, %24, %c0_i32_18 : i32
    scf.if %25 {
      %c0_19 = arith.constant 0 : index
      %c0_20 = arith.constant 0 : index
      %26 = vector.load %arg9[%c0_19, %c0_20] : memref<16x128xf32, #tpu.memory_space<vmem>>, vector<16x128xf32>
      %c0_21 = arith.constant 0 : index
      %c0_22 = arith.constant 0 : index
      %27 = vector.load %arg7[%c0_21, %c0_22] : memref<1x128xf32, #tpu.memory_space<vmem>>, vector<1x128xf32>
      %28 = vector.broadcast %27 : vector<1x128xf32> to vector<16x128xf32>
      %29 = arith.mulf %26, %28 : vector<16x128xf32>
      %c0_23 = arith.constant 0 : index
      %c0_24 = arith.constant 0 : index
      %30 = vector.load %arg8[%c0_23, %c0_24] : memref<16x128xf32, #tpu.memory_space<vmem>>, vector<16x128xf32>
      tpu.vector_store %arg8[%c0_23, %c0_24], %29 {strides = array<i32>} : memref<16x128xf32, #tpu.memory_space<vmem>>, vector<16x128xf32>,
    } else {
    }
    return
  }
  func.func @transform_0(%arg0: i32, %arg1: i32) -> (i32, i32) {
    %c0_i32 = arith.constant 0 : i32
    %c0_i32_0 = arith.constant 0 : i32
    return %arg0, %c0_i32 : i32, i32
  }
  func.func @transform_1(%arg0: i32, %arg1: i32) -> (i32, i32) {
    %c0_i32 = arith.constant 0 : i32
    %c0_i32_0 = arith.constant 0 : i32
    return %c0_i32, %arg1 : i32, i32
  }
  func.func @transform_2(%arg0: i32, %arg1: i32) -> (i32, i32) {
    %c0_i32 = arith.constant 0 : i32
    %c0_i32_0 = arith.constant 0 : i32
    return %c0_i32, %arg1 : i32, i32
  }
  func.func @transform_3(%arg0: i32, %arg1: i32) -> (i32, i32) {
    %c0_i32 = arith.constant 0 : i32
    %c0_i32_0 = arith.constant 0 : i32
    return %arg1, %c0_i32 : i32, i32
  }
  func.func @transform_4(%arg0: i32, %arg1: i32) -> (i32, i32) {
    %c0_i32 = arith.constant 0 : i32
    %c0_i32_0 = arith.constant 0 : i32
    return %c0_i32, %arg1 : i32, i32
  }
  func.func @transform_5(%arg0: i32, %arg1: i32) -> (i32, i32) {
    %c0_i32 = arith.constant 0 : i32
    %c0_i32_0 = arith.constant 0 : i32
    %c0_i32_1 = arith.constant 0 : i32
    return %c0_i32, %c0_i32_0 : i32, i32
  }
  func.func @transform_6(%arg0: i32, %arg1: i32) -> (i32, i32) {
    %c0_i32 = arith.constant 0 : i32
    %c0_i32_0 = arith.constant 0 : i32
    return %arg0, %c0_i32 : i32, i32
  }
}

</mosaic_0001>

<bundles_post_ra>
// kernel: tpu_custom_call.1
= control target key start
LH: loop header
LB: loop body
LE: loop exit
PB: predicated region body
PF: predicated region fallthrough
CT: control target
= control target key end

     0   :  { %11 = vsyncpa [#allocation4], 0  ;;  %s541_s0 = inlined_call_operand.hbm [shape: f32[16,128], index: 0, kind: input, shape index: {}]   ;;  %s542_s1 = inlined_call_operand.hbm [shape: f32[128,128], index: 1, kind: input, shape index: {}]   ;;  %s543_s2 = inlined_call_operand.hbm [shape: f32[128,128], index: 2, kind: input, shape index: {}]   ;;  %s544_s3 = inlined_call_operand.hbm [shape: f32[128,128], index: 3, kind: input, shape index: {}]   ;;  %s545_s4 = inlined_call_operand.vmem [shape: f32[1,128], index: 4, kind: input, shape index: {}]   ;;  %s546_s5 = inlined_call_operand.vmem [shape: f32[1,128], index: 5, kind: input, shape index: {}]   ;;  %s547_s6 = inlined_call_operand.hbm [shape: f32[16,128], index: 6, kind: output, shape index: {}]  }
   0x1   :  { %12 = vsyncpa [#allocation7], 0 }
   0x2   :  { %13 = vsyncpa [#allocation10], 0 }
   0x3   :  { %14 = vsyncpa [#allocation5], 0  ;;  %s32_s23 = sshll.u32 %s542_s1, 4  ;;  %s463_s24 = smov [#allocation6]   ;;  %s33_s23 = int_to_ptr.hbm [resolvable:$true] %s32_s23 }
   0x4   :  { %s34_s25 = sshll.u32 %s463_s24, 4  ;;  %s19_s28 = sshll.u32 %s541_s0, 4  ;;  %s35_s25 = int_to_ptr.vmem [resolvable:$true] %s34_s25  ;;  %s20_s28 = int_to_ptr.hbm [resolvable:$true] %s19_s28 }
   0x5   :  { %s464_s29 = smov 128   ;;  %s465_s30 = smov 8  }
   0x6   :  { %40 = dma.hbm_to_vmem [thread:$0]  %s33_s23, 2048, %s35_s25, [#allocation7], %s464_s29, %s464_s29, %s465_s30  }
   0x7   :  { %s466_s7 = smov [#allocation3]   ;;  %s45_s1 = sshll.u32 %s543_s2, 4  ;;  %s46_s1 = int_to_ptr.hbm [resolvable:$true] %s45_s1 }
   0x8   :  { %s21_s8 = sshll.u32 %s466_s7, 4  ;;  %s58_s12 = sshll.u32 %s544_s3, 4  ;;  %s22_s8 = int_to_ptr.vmem [resolvable:$true] %s21_s8  ;;  %s59_s12 = int_to_ptr.hbm [resolvable:$true] %s58_s12 }
   0x9   :  { %27 = dma.hbm_to_vmem [thread:$0]  %s20_s28, 256, %s22_s8, [#allocation4], %s464_s29, %s464_s29, %s465_s30  }
   0xa   :  { %s467_s13 = smov [#allocation8]   ;;  %s468_s15 = smov [#allocation9]  }
   0xb   :  { %s47_s14 = sshll.u32 %s467_s13, 4  ;;  %s60_s2 = sshll.u32 %s468_s15, 4  ;;  %s48_s14 = int_to_ptr.vmem [resolvable:$true] %s47_s14  ;;  %s61_s2 = int_to_ptr.vmem [resolvable:$true] %s60_s2 }
   0xc   :  { %53 = dma.hbm_to_vmem [thread:$0]  %s46_s1, 2048, %s48_s14, [#allocation7], %s464_s29, %s464_s29, %s465_s30  }
   0xd   :  { %66 = dma.hbm_to_vmem [thread:$0]  %s59_s12, 2048, %s61_s2, [#allocation10], %s464_s29, %s464_s29, %s465_s30  }
   0xe   :  { %455 = dma.done.wait [#allocation4], 256  }
   0xf   :  { %456 = vsyncadd [#allocation4], 4294967040 }
  0x10   :  { %457 = dma.done.wait [#allocation7], 4096  }
  0x11   :  { %458 = vsyncadd [#allocation7], 4294963200 }
  0x12   :  { %459 = dma.done.wait [#allocation10], 2048  }
  0x13   :  { %460 = vsyncadd [#allocation10], 4294965248  ;;  %v155_v0 = vld [vmem:[#allocation6 + $0x78] sm:$0xff]  ;;  %v154_v1 = vld [vmem:[#allocation6 + $0x70] sm:$0xff]  ;;  %s469_s18 = smov [#allocation11]   ;;  %s285_s22 = sshll.u32 %s547_s6, 4  ;;  %s286_s22 = int_to_ptr.hbm [resolvable:$true] %s285_s22 }
  0x14   :  { %156 = vmatpush.msra.mxu1 %v155_v0  ;;  %v153_v2 = vld [vmem:[#allocation6 + $0x68] sm:$0xff]  ;;  %v152_v3 = vld [vmem:[#allocation6 + $0x60] sm:$0xff]  ;;  %v110_v4 = vld [vmem:[#allocation8 + $0x78] sm:$0xff]  ;;  %s283_s19 = sshll.u32 %s469_s18, 4  ;;  %s284_s19 = int_to_ptr.vmem [resolvable:$true] %s283_s19 }
  0x15   :  { %111 = vmatpush.msra.mxu0 %v110_v4  ;;  %v109_v5 = vld [vmem:[#allocation8 + $0x70] sm:$0xff]  ;;  %v151_v6 = vld [vmem:[#allocation6 + $0x58] sm:$0xff]  ;;  %302 = vmatpush.msra.mxu3 %v110_v4  ;;  %v108_v7 = vld [vmem:[#allocation8 + $0x68] sm:$0xff] }
  0x16   :  { %157 = vmatpush.msra.mxu1 %v154_v1  ;;  %v150_v8 = vld [vmem:[#allocation6 + $0x50] sm:$0xff]  ;;  %v107_v9 = vld [vmem:[#allocation8 + $0x60] sm:$0xff]  ;;  %v149_v10 = vld [vmem:[#allocation6 + $0x48] sm:$0xff] }
  0x17   :  { %112 = vmatpush.msra.mxu0 %v109_v5  ;;  %303 = vmatpush.msra.mxu3 %v109_v5  ;;  %v106_v11 = vld [vmem:[#allocation8 + $0x58] sm:$0xff]  ;;  %v148_v12 = vld [vmem:[#allocation6 + $0x40] sm:$0xff]  ;;  %v105_v13 = vld [vmem:[#allocation8 + $0x50] sm:$0xff] }
  0x18   :  { %158 = vmatpush.msra.mxu1 %v153_v2  ;;  %v147_v14 = vld [vmem:[#allocation6 + $0x38] sm:$0xff]  ;;  %v104_v15 = vld [vmem:[#allocation8 + $0x48] sm:$0xff]  ;;  %v146_v16 = vld [vmem:[#allocation6 + $0x30] sm:$0xff] }
  0x19   :  { %113 = vmatpush.msra.mxu0 %v108_v7  ;;  %304 = vmatpush.msra.mxu3 %v108_v7  ;;  %v103_v17 = vld [vmem:[#allocation8 + $0x40] sm:$0xff]  ;;  %v145_v18 = vld [vmem:[#allocation6 + $0x28] sm:$0xff]  ;;  %v102_v19 = vld [vmem:[#allocation8 + $0x38] sm:$0xff] }
  0x1a   :  { %159 = vmatpush.msra.mxu1 %v152_v3  ;;  %v144_v20 = vld [vmem:[#allocation6 + $0x20] sm:$0xff]  ;;  %v101_v21 = vld [vmem:[#allocation8 + $0x30] sm:$0xff]  ;;  %v143_v22 = vld [vmem:[#allocation6 + $0x18] sm:$0xff] }
  0x1b   :  { %114 = vmatpush.msra.mxu0 %v107_v9  ;;  %305 = vmatpush.msra.mxu3 %v107_v9  ;;  %v100_v23 = vld [vmem:[#allocation8 + $0x28] sm:$0xff]  ;;  %v142_v24 = vld [vmem:[#allocation6 + $0x10] sm:$0xff]  ;;  %v99_v25 = vld [vmem:[#allocation8 + $0x20] sm:$0xff] }
  0x1c   :  { %160 = vmatpush.msra.mxu1 %v151_v6  ;;  %v141_v26 = vld [vmem:[#allocation6 + $0x8] sm:$0xff]  ;;  %v98_v27 = vld [vmem:[#allocation8 + $0x18] sm:$0xff]  ;;  %v140_v28 = vld [vmem:[#allocation6] sm:$0xff] }
  0x1d   :  { %115 = vmatpush.msra.mxu0 %v106_v11  ;;  %306 = vmatpush.msra.mxu3 %v106_v11  ;;  %v97_v29 = vld [vmem:[#allocation8 + $0x10] sm:$0xff]  ;;  %v96_v31 = vld [vmem:[#allocation8 + $0x8] sm:$0xff]  ;;  %v95_v32 = vld [vmem:[#allocation8] sm:$0xff] }
  0x1e   :  { %161 = vmatpush.msra.mxu1 %v150_v8  ;;  %v93_v30 = vld [vmem:[#allocation3] sm:$0xff]  ;;  %v94_v33 = vld [vmem:[#allocation3 + $0x8] sm:$0xff]  ;;  %v236_v36 = vld [vmem:[#allocation9 + $0x68] sm:$0xff] }
  0x1f   :  { %116 = vmatpush.msra.mxu0 %v105_v13  ;;  %307 = vmatpush.msra.mxu3 %v105_v13  ;;  %v238_v34 = vld [vmem:[#allocation9 + $0x78] sm:$0xff]  ;;  %v237_v35 = vld [vmem:[#allocation9 + $0x70] sm:$0xff]  ;;  %v235_v37 = vld [vmem:[#allocation9 + $0x60] sm:$0xff] }
  0x20   :  { %162 = vmatpush.msra.mxu1 %v149_v10  ;;  %239 = vmatpush.msra.mxu2 %v238_v34  ;;  %v234_v38 = vld [vmem:[#allocation9 + $0x58] sm:$0xff]  ;;  %v233_v39 = vld [vmem:[#allocation9 + $0x50] sm:$0xff]  ;;  %v232_v40 = vld [vmem:[#allocation9 + $0x48] sm:$0xff] }
  0x21   :  { %117 = vmatpush.msra.mxu0 %v104_v15  ;;  %308 = vmatpush.msra.mxu3 %v104_v15  ;;  %v231_v41 = vld [vmem:[#allocation9 + $0x40] sm:$0xff]  ;;  %v230_v42 = vld [vmem:[#allocation9 + $0x38] sm:$0xff]  ;;  %v229_v43 = vld [vmem:[#allocation9 + $0x30] sm:$0xff] }
  0x22   :  { %163 = vmatpush.msra.mxu1 %v148_v12  ;;  %240 = vmatpush.msra.mxu2 %v237_v35  ;;  %v228_v44 = vld [vmem:[#allocation9 + $0x28] sm:$0xff]  ;;  %v227_v45 = vld [vmem:[#allocation9 + $0x20] sm:$0xff]  ;;  %v226_v46 = vld [vmem:[#allocation9 + $0x18] sm:$0xff] }
  0x23   :  { %118 = vmatpush.msra.mxu0 %v103_v17  ;;  %309 = vmatpush.msra.mxu3 %v103_v17  ;;  %v225_v47 = vld [vmem:[#allocation9 + $0x10] sm:$0xff]  ;;  %v224_v48 = vld [vmem:[#allocation9 + $0x8] sm:$0xff]  ;;  %v223_v49 = vld [vmem:[#allocation9] sm:$0xff] }
  0x24   :  { %164 = vmatpush.msra.mxu1 %v147_v14  ;;  %241 = vmatpush.msra.mxu2 %v236_v36  ;;  %v325_v0 = vld [vmem:[%s545_s4] ss:$0 sm:$0xff] }
  0x25   :  { %119 = vmatpush.msra.mxu0 %v102_v19  ;;  %310 = vmatpush.msra.mxu3 %v102_v19 }
  0x26   :  { %165 = vmatpush.msra.mxu1 %v146_v16  ;;  %242 = vmatpush.msra.mxu2 %v235_v37 }
  0x27   :  { %120 = vmatpush.msra.mxu0 %v101_v21  ;;  %311 = vmatpush.msra.mxu3 %v101_v21 }
  0x28   :  { %166 = vmatpush.msra.mxu1 %v145_v18  ;;  %243 = vmatpush.msra.mxu2 %v234_v38 }
  0x29   :  { %121 = vmatpush.msra.mxu0 %v100_v23  ;;  %312 = vmatpush.msra.mxu3 %v100_v23  ;;  %v326_v23 = vld [vmem:[%s546_s5] ss:$0 sm:$0xff] }
  0x2a   :  { %167 = vmatpush.msra.mxu1 %v144_v20  ;;  %244 = vmatpush.msra.mxu2 %v233_v39 }
  0x2b   :  { %122 = vmatpush.msra.mxu0 %v99_v25  ;;  %313 = vmatpush.msra.mxu3 %v99_v25 }
  0x2c   :  { %168 = vmatpush.msra.mxu1 %v143_v22  ;;  %245 = vmatpush.msra.mxu2 %v232_v40 }
  0x2d   :  { %123 = vmatpush.msra.mxu0 %v98_v27  ;;  %314 = vmatpush.msra.mxu3 %v98_v27 }
  0x2e   :  { %169 = vmatpush.msra.mxu1 %v142_v24  ;;  %246 = vmatpush.msra.mxu2 %v231_v41 }
  0x2f   :  { %124 = vmatpush.msra.mxu0 %v97_v29  ;;  %315 = vmatpush.msra.mxu3 %v97_v29 }
  0x30   :  { %170 = vmatpush.msra.mxu1 %v141_v26  ;;  %247 = vmatpush.msra.mxu2 %v230_v42 }
  0x31   :  { %125 = vmatpush.msra.mxu0 %v96_v31  ;;  %316 = vmatpush.msra.mxu3 %v96_v31 }
  0x32   :  { %171 = vmatpush.msra.mxu1 %v140_v28  ;;  %248 = vmatpush.msra.mxu2 %v229_v43 }
  0x33   :  { %172 = vmatmul.f32.vlgmr.msra.gmra.mxu1 %v93_v30  ;;  %126 = vmatpush.msra.mxu0 %v95_v32 }
  0x34   :  { %127 = vmatmul.f32.vlgmr.msra.gmra.mxu0 %v93_v30  ;;  %317 = vmatpush.msra.mxu3 %v95_v32 }
  0x35   :  { %130 = vmatmul.f32.vlgmr.msra.gmra.mxu3 %v94_v33  ;;  %249 = vmatpush.msra.mxu2 %v228_v44 }
  0x37   :  { %250 = vmatpush.msra.mxu2 %v227_v45 }
  0x39   :  { %251 = vmatpush.msra.mxu2 %v226_v46 }
  0x3b   :  { %175 = vmatmul.f32.gmra.mxu1 %v94_v33  ;;  %252 = vmatpush.msra.mxu2 %v225_v47 }
  0x3d   :  { %253 = vmatpush.msra.mxu2 %v224_v48 }
  0x3f   :  { %254 = vmatpush.msra.mxu2 %v223_v49 }
  0xb0   :  { %v173_v50 = vpop.f32.mrf.mxu1 }
  0xb1   :  { %v300_v51 = vmul.f32 -1.442695, %v173_v50  ;;  %v128_v1 = vpop.f32.mrf.mxu0 }
  0xb2   :  { %v138_v7 = vmul.f32 %v325_v0, %v128_v1 }
  0xb3   :  { %327 = vpow2.f32 %v300_v51 }
  0xb8   :  { %v176_v52 = vpop.f32.mrf.mxu1  ;;  %v131_v15 = vpop.f32.mrf.mxu3 }
  0xb9   :  { %v328_v53 = vpop.eup %327  ;;  %v301_v54 = vmul.f32 -1.442695, %v176_v52  ;;  %v139_v19 = vmul.f32 %v325_v0, %v131_v15 }
  0xba   :  { %v185_v55 = vadd.f32 1.0, %v328_v53 }
  0xbb   :  { %329 = vpow2.f32 %v301_v54 }
  0xbc   :  { %331 = vrcp.f32 %v185_v55  ;;  %v198_v61 = vand.u32 2147483648, %v185_v55  ;;  %v196_v63 = vand.u32 2147483647, %v185_v55  ;;  %vm192_vm1 = vweird.f32 %v185_v55 }
  0xbe   :  { %v199_v4 = vor.u32 1.1754944e-38, %v198_v61  ;;  %vm197_vm3 = vcmp.eq.f32.partialorder %v196_v63, 8.507059e+37 }
  0xc1   :  { %v330_v56 = vpop.eup %329 }
  0xc2   :  { %v332_v57 = vpop.eup %331  ;;  %v186_v58 = vadd.f32 1.0, %v330_v56 }
  0xc3   :  { %v188_v59 = vmul.f32 %v332_v57, %v185_v55  ;;  %vm193_vm0 = vweird.f32 %v332_v57 }
  0xc4   :  { %333 = vrcp.f32 %v186_v58  ;;  %vm194_vm2 = vmor %vm192_vm1, %vm193_vm0  ;;  %v213_v11 = vand.u32 2147483648, %v186_v58  ;;  %v211_v13 = vand.u32 2147483647, %v186_v58  ;;  %vm207_vm5 = vweird.f32 %v186_v58 }
  0xc5   :  { %v189_v60 = vsub.f32 1.0, %v188_v59 }
  0xc6   :  { %v214_v17 = vor.u32 1.1754944e-38, %v213_v11  ;;  %vm212_vm7 = vcmp.eq.f32.partialorder %v211_v13, 8.507059e+37 }
  0xc7   :  { %v190_v62 = vmul.f32 %v332_v57, %v189_v60 }
  0xc9   :  { %v191_v2 = vadd.f32 %v332_v57, %v190_v62 }
  0xca   :  { %v334_v3 = vpop.eup %333 }
  0xcb   :  { %v195_v5 = vsel %vm194_vm2, %v332_v57, %v191_v2  ;;  %v203_v6 = vmul.f32 %v334_v3, %v186_v58  ;;  %vm208_vm4 = vweird.f32 %v334_v3 }
  0xcc   :  { %v200_v8 = vsel %vm197_vm3, %v199_v4, %v195_v5  ;;  %vm209_vm6 = vmor %vm207_vm5, %vm208_vm4 }
  0xcd   :  { %v217_v9 = vmul.f32 %v200_v8, %v173_v50  ;;  %v204_v10 = vsub.f32 1.0, %v203_v6 }
  0xcf   :  { %v205_v12 = vmul.f32 %v334_v3, %v204_v10  ;;  %v219_v14 = vmul.f32 %v217_v9, %v138_v7 }
  0xd1   :  { %v206_v16 = vadd.f32 %v334_v3, %v205_v12  ;;  %255 = vmatmul.f32.vlgmr.msra.gmra.mxu2 %v219_v14 }
  0xd3   :  { %v210_v18 = vsel %vm209_vm6, %v334_v3, %v206_v16 }
  0xd4   :  { %v215_v20 = vsel %vm212_vm7, %v214_v17, %v210_v18 }
  0xd5   :  { %v218_v21 = vmul.f32 %v215_v20, %v176_v52 }
  0xd7   :  { %v220_v22 = vmul.f32 %v218_v21, %v139_v19 }
  0xd9   :  { %258 = vmatmul.f32.gmra.mxu2 %v220_v22 }
 0x154   :  { %v256_v24 = vpop.f32.mrf.mxu2 }
 0x155   :  { %v275_v25 = vmul.f32 %v326_v23, %v256_v24 }
 0x157   :  { %277 = vst [vmem:[#allocation11] sm:$0xff] %v275_v25 }
 0x15c   :  { %v259_v26 = vpop.f32.mrf.mxu2 }
 0x15d   :  { %v276_v27 = vmul.f32 %v326_v23, %v259_v26 }
 0x15f   :  { %278 = vst [vmem:[#allocation11 + $0x8] sm:$0xff] %v276_v27 }
 0x160   :  { %291 = dma.vmem_to_hbm [thread:$0]  %s284_s19, 256, %s286_s22, [#allocation5], %s464_s29, %s464_s29, %s465_s30  }
 0x161   :  { %461 = dma.done.wait [#allocation5], 256  }
 0x162   :  { %462 = vsyncadd [#allocation5], 4294967040 }
 0x163   :  { %296 = vsyncpa [#allocation4], 1 }
 0x164   :  { %297 = vsyncpa [#allocation7], 1 }
 0x165   :  { %298 = vsyncpa [#allocation10], 1 }
 0x166   :  { %299 = vsyncpa [#allocation5], 1 }

</bundles_post_ra>
